<compile_context>
chip_gen: v7x
topology: tpu7x:2x2x1
jax: 0.10.0
libtpu: 0.0.40
codegen_flags: <defaults>
</compile_context>

<pallas_src>
import math
import numpy as np

import jax
import jax.numpy as jnp
from jax.experimental import pallas as pl
from jax.experimental.pallas import tpu as pltpu


# ----------------------------------------------------------------------------
# Kernel 1: attention + soft-assignment + VLAD aggregation + normalizations.
# grid = (Bp // Bt, N // Nt); the N axis is a streamed reduction.
# ----------------------------------------------------------------------------
def netvlad_core_kernel(xt_ref,                 # (Bt, Nt, F)   compute dtype
                        wfused_ref,             # (F, 128+K)    cdt  ([aw1 | cw])
                        ab1_ref,                # (1, 128) f32
                        aw2_ref, ab2_ref,       # (128, 32) cdt, (1, 32) f32
                        aw3_ref, ab3_ref,       # (1, 32) f32,  (1, 1)  f32
                        cbs_ref, cbb_ref,       # (1, K) f32  (bn1 folded)
                        cw2t_ref,               # (K, F) f32  (cluster_weights2^T)
                        vlad_ref,               # out (Bt, K, F) cdt
                        att_ref,                # out (Bt, 1, Nt) f32
                        acc_vlad,               # scratch (Bt, K, F) f32
                        acc_asum):              # scratch (Bt, K) f32
    n = pl.program_id(1)
    Bt, Nt, F = xt_ref.shape
    K = cbs_ref.shape[1]
    cdt = xt_ref.dtype

    @pl.when(n == 0)
    def _():
        acc_vlad[...] = jnp.zeros_like(acc_vlad)
        acc_asum[...] = jnp.zeros_like(acc_asum)

    x3 = xt_ref[...]                             # (Bt, Nt, F)
    x2 = x3.reshape(Bt * Nt, F)                  # fuse batch into the matmul M dim

    # --- single fused MXU pass over x2: [attention conv1 | cluster assignment] ---
    h_all = jnp.dot(x2, wfused_ref[...], preferred_element_type=jnp.float32)
    h1 = jnp.maximum(h_all[:, :128] + ab1_ref[...], 0.0)                 # (Bt*Nt, 128)
    act = h_all[:, 128:128 + K]                                          # (Bt*Nt, K)

    # --- attention branch tail: conv2 (MXU) + conv3 as VPU mul + lane reduce ---
    h2 = jnp.maximum(
        jnp.dot(h1.astype(cdt), aw2_ref[...], preferred_element_type=jnp.float32)
        + ab2_ref[...], 0.0)                                             # (Bt*Nt, 32)
    att = jax.nn.sigmoid(
        jnp.sum(h2 * aw3_ref[...], axis=-1, keepdims=True) + ab3_ref[...])  # (Bt*Nt, 1)

    # --- soft cluster assignment (bn1 folded) + softmax + attention weighting ---
    act = act * cbs_ref[...] + cbb_ref[...]
    act = act - jnp.max(act, axis=-1, keepdims=True)
    act = jnp.exp(act)
    act = act * pl.reciprocal(jnp.sum(act, axis=-1, keepdims=True), approx=False)
    act = act * att                                                      # (Bt*Nt, K)

    act3 = act.reshape(Bt, Nt, K)
    acc_asum[...] += jnp.sum(act3, axis=1)                               # (Bt, K)
    acc_vlad[...] += jnp.einsum('bnk,bnf->bkf', act3.astype(cdt), x3,
                                preferred_element_type=jnp.float32)      # (Bt, K, F)

    # lane-dense attention store (last dim = Nt)
    att_ref[...] = att.reshape(Bt, 1, Nt)

    @pl.when(n == pl.num_programs(1) - 1)
    def _():
        a = acc_asum[...][:, :, None] * cw2t_ref[...][None, :, :]        # (Bt, K, F)
        vlad = acc_vlad[...] - a
        # intra-normalize over F per cluster (lane reduction)
        ssq = jnp.sum(vlad * vlad, axis=-1, keepdims=True)               # (Bt, K, 1)
        r = jax.lax.rsqrt(jnp.maximum(ssq, 1e-24))
        # global L2 norm derived from ssq (no second square+reduce over K*F)
        tot = jnp.sum(ssq * (r * r), axis=1, keepdims=True)              # (Bt, 1, 1)
        scale = r * jax.lax.rsqrt(jnp.maximum(tot, 1e-24))
        vlad_ref[...] = (vlad * scale).astype(vlad_ref.dtype)


# ----------------------------------------------------------------------------
# Kernel 2: batched hidden projection (streamed over the K*F contraction),
# bn2 and context gating, for the whole batch in one pallas_call.
# ----------------------------------------------------------------------------
def netvlad_tail_kernel(vf_ref,                 # (B, tkf) cdt
                        hid_ref,                # (tkf, D) cdt
                        b2s_ref, b2b_ref,       # (1, D) f32 (bn2 folded)
                        gw_ref,                 # (D, D) cdt
                        gbs_ref, gbb_ref,       # (1, D) f32 (gating bn folded)
                        out_ref,                # out (B, D) f32
                        acc_ref):               # scratch (B, D) f32
    j = pl.program_id(0)

    @pl.when(j == 0)
    def _():
        acc_ref[...] = jnp.zeros_like(acc_ref)

    acc_ref[...] += jnp.dot(vf_ref[...], hid_ref[...],
                            preferred_element_type=jnp.float32)

    @pl.when(j == pl.num_programs(0) - 1)
    def _():
        out = acc_ref[...] * b2s_ref[...] + b2b_ref[...]                  # bn2 (eval)
        gates = jnp.dot(out.astype(gw_ref.dtype), gw_ref[...],
                        preferred_element_type=jnp.float32)
        gates = jax.nn.sigmoid(gates * gbs_ref[...] + gbb_ref[...])       # gating bn (eval)
        out_ref[...] = out * gates


# ----------------------------------------------------------------------------
# Wrapper helpers
# ----------------------------------------------------------------------------
def _full_spec(arr):
    nd = arr.ndim
    return pl.BlockSpec(arr.shape, lambda *_, _nd=nd: (0,) * _nd)


def _vmem_limit_bytes():
    # 0.75 * physical VMEM, capped at 100 MiB (safe on v5e/v6e's 128 MiB; on
    # v7x's 64 MiB this yields 48 MiB per the review guidance).
    try:
        cap = pltpu.get_tpu_info().vmem_capacity_bytes
    except Exception:
        cap = 64 * 1024 * 1024
    return int(min(cap * 3 // 4, 100 * 1024 * 1024))


def prepare_params(params, compute_dtype=jnp.bfloat16):
    """One-time weight preparation: casts, aw1|cw fusion, hid row permutation."""
    cdt = compute_dtype
    F, K = params['cw'].shape
    D = params['hid'].shape[1]

    prep = dict(
        # fused [attention conv1 | cluster assignment] weight
        wfused=jnp.concatenate([params['aw1'], params['cw']], axis=1).astype(cdt),
        ab1=params['ab1'],
        aw2=params['aw2'].astype(cdt), ab2=params['ab2'],
        aw3row=params['aw3'].reshape(1, 32).astype(jnp.float32),
        ab3=params['ab3'],
        cbs=params['cbs'], cbb=params['cbb'],
        cw2t=params['cw2'].T,                                     # (K, F) f32
        # hidden1_weights rows reordered from torch's f*K+k to our k*F+f layout
        hid=params['hid'].reshape(F, K, D).transpose(1, 0, 2).reshape(K * F, D).astype(cdt),
        b2s=params['b2s'], b2b=params['b2b'],
        gw=params['gw'].astype(cdt),
        gbs=params['gbs'], gbb=params['gbb'],
    )
    return prep


def netvlad_forward(x, prep):
    """x: (B, F, N) f32, prep from prepare_params().
    Returns (vlad (B, D) f32, attention (B, N, K) f32)."""
    B, F, N = x.shape
    cdt = prep['wfused'].dtype
    itemsize = jnp.dtype(cdt).itemsize
    K = prep['cbs'].shape[1]
    KF, D = prep['hid'].shape
    vmem_limit = _vmem_limit_bytes()

    # One transpose outside the kernel (no per-grid-step XLU transpose).
    xt = jnp.swapaxes(x, 1, 2).astype(cdt)                       # (B, N, F)

    # --- N tiling: per-step VMEM independent of N (needed at production N*F) ---
    x_tile_budget = 8 * 1024 * 1024
    if N % 128 == 0 and N * F * itemsize > x_tile_budget:
        Nt = 128
        for cand in range(128, N + 1, 128):
            if N % cand == 0 and cand * F * itemsize <= x_tile_budget:
                Nt = cand
    else:
        Nt = N

    # --- batch blocking: keep >= 2 batch grid steps when B > 1 (megacore) ---
    bt_cap = pl.cdiv(B, 2) if B > 1 else 1
    Bt = max(1, min(bt_cap, max(1, 512 // max(Nt, 1))))
    Bp = pl.cdiv(B, Bt) * Bt
    if Bp != B:
        xt = jnp.pad(xt, ((0, Bp - B), (0, 0), (0, 0)))

    core_params = [prep['wfused'], prep['ab1'], prep['aw2'], prep['ab2'],
                   prep['aw3row'], prep['ab3'], prep['cbs'], prep['cbb'], prep['cw2t']]

    param_bytes = sum(int(p.size) * p.dtype.itemsize for p in core_params)
    core_cost = pl.CostEstimate(
        flops=int(2 * Bp * N * (F * (128 + K) + 128 * 32 + 32 + F * K)),
        transcendentals=int(Bp * N * (K + 2) + 2 * Bp * K),
        bytes_accessed=int(xt.size * xt.dtype.itemsize
                           + (N // Nt) * param_bytes
                           + Bp * K * F * itemsize + 4 * Bp * N))

    vlad_kf, att1 = pl.pallas_call(
        netvlad_core_kernel,
        grid=(Bp // Bt, N // Nt),
        in_specs=[pl.BlockSpec((Bt, Nt, F), lambda b, n: (b, n, 0))]
                 + [_full_spec(p) for p in core_params],
        out_specs=[pl.BlockSpec((Bt, K, F), lambda b, n: (b, 0, 0)),
                   pl.BlockSpec((Bt, 1, Nt), lambda b, n: (b, 0, n))],
        out_shape=(jax.ShapeDtypeStruct((Bp, K, F), cdt),
                   jax.ShapeDtypeStruct((Bp, 1, N), jnp.float32)),
        scratch_shapes=[pltpu.VMEM((Bt, K, F), jnp.float32),
                        pltpu.VMEM((Bt, K), jnp.float32)],
        compiler_params=pltpu.CompilerParams(
            dimension_semantics=("parallel", "arbitrary"),
            vmem_limit_bytes=vmem_limit),
        cost_estimate=core_cost,
    )(xt, *core_params)

    # VLAD already in (K, F) layout and compute dtype -> no cast / relayout pass.
    vf = vlad_kf.reshape(Bp, KF)
    hid = prep['hid']
    b2s, b2b = prep['b2s'], prep['b2b']
    gw, gbs, gbb = prep['gw'], prep['gbs'], prep['gbb']

    # --- tail contraction tile: biggest K*F tile that fits the VMEM budget ---
    tail_budget = 24 * 1024 * 1024

    def tail_bytes(t):
        return ((2 * t * D + Bp * t) * itemsize            # hid (double-buffered) + vf tile
                + 3 * Bp * D * 4 + 2 * D * D * itemsize)   # acc/out + gw

    if tail_bytes(KF) <= tail_budget:
        tkf = KF
    else:
        tkf = 128 if KF % 128 == 0 else KF
        top = (KF // 128) * 128
        for cand in range(top, 0, -128):
            if KF % cand == 0 and tail_bytes(cand) <= tail_budget:
                tkf = cand
                break

    tail_cost = pl.CostEstimate(
        flops=int(2 * Bp * KF * D + 2 * Bp * D * D),
        transcendentals=int(Bp * D),
        bytes_accessed=int(vf.size * vf.dtype.itemsize + hid.size * hid.dtype.itemsize
                           + 4 * (Bp * D + D * D + 4 * D)))

    out = pl.pallas_call(
        netvlad_tail_kernel,
        grid=(KF // tkf,),
        in_specs=[pl.BlockSpec((Bp, tkf), lambda j: (0, j)),
                  pl.BlockSpec((tkf, D), lambda j: (j, 0)),
                  _full_spec(b2s), _full_spec(b2b),
                  _full_spec(gw), _full_spec(gbs), _full_spec(gbb)],
        out_specs=pl.BlockSpec((Bp, D), lambda j: (0, 0)),
        out_shape=jax.ShapeDtypeStruct((Bp, D), jnp.float32),
        scratch_shapes=[pltpu.VMEM((Bp, D), jnp.float32)],
        compiler_params=pltpu.CompilerParams(
            dimension_semantics=("arbitrary",),           # reduction axis
            vmem_limit_bytes=vmem_limit),
        cost_estimate=tail_cost,
    )(vf, hid, b2s, b2b, gw, gbs, gbb)

    # Module contract: attention.squeeze(-1) == (B, N, K) with K identical columns.
    att = jnp.broadcast_to(att1[:B, 0, :, None], (B, N, K))
    return out[:B], att


# ----------------------------------------------------------------------------
# Deterministic parameter initialization (mirrors NetVLADLoupe.__init__ shapes;
# BatchNorm folded into per-channel scale/shift, eval mode).
# ----------------------------------------------------------------------------
def init_params(key, F, K, D):
    keys = jax.random.split(key, 32)
    it = iter(keys)
    nk = lambda: next(it)

    def bn_folded(dim, eps=1e-5):
        gamma = 1.0 + 0.1 * jax.random.normal(nk(), (dim,), jnp.float32)
        beta = 0.1 * jax.random.normal(nk(), (dim,), jnp.float32)
        mean = 0.1 * jax.random.normal(nk(), (dim,), jnp.float32)
        var = 1.0 + 0.1 * jnp.abs(jax.random.normal(nk(), (dim,), jnp.float32))
        scale = gamma / jnp.sqrt(var + eps)
        shift = beta - mean * scale
        return scale, shift

    # attention_conv1 (F->128, k=1) + attention_bn1
    w1 = jax.random.normal(nk(), (F, 128), jnp.float32) / math.sqrt(F)
    b1 = 0.1 * jax.random.normal(nk(), (128,), jnp.float32)
    s1, sh1 = bn_folded(128)
    aw1 = w1 * s1[None, :]
    ab1 = (b1 * s1 + sh1).reshape(1, 128)

    # attention_conv2 (128->32, k=1) + attention_bn2
    w2 = jax.random.normal(nk(), (128, 32), jnp.float32) / math.sqrt(128)
    b2 = 0.1 * jax.random.normal(nk(), (32,), jnp.float32)
    s2, sh2 = bn_folded(32)
    aw2 = w2 * s2[None, :]
    ab2 = (b2 * s2 + sh2).reshape(1, 32)

    # attention_conv3 (32->1, k=1)  (no BN)
    aw3 = jax.random.normal(nk(), (32, 1), jnp.float32) / math.sqrt(32)
    ab3 = (0.1 * jax.random.normal(nk(), (1,), jnp.float32)).reshape(1, 1)

    # cluster_weights (F,K), bn1(K), cluster_weights2 (1,F,K) -> (F,K)
    cw = jax.random.normal(nk(), (F, K), jnp.float32) / math.sqrt(F)
    cbs, cbb = bn_folded(K)
    cbs, cbb = cbs.reshape(1, K), cbb.reshape(1, K)
    cw2 = jax.random.normal(nk(), (F, K), jnp.float32) / math.sqrt(F)

    # hidden1_weights (K*F, D), rows indexed f*K + k (torch flatten order), bn2(D)
    hid = jax.random.normal(nk(), (F * K, D), jnp.float32) / math.sqrt(F)
    b2s, b2b = bn_folded(D)
    b2s, b2b = b2s.reshape(1, D), b2b.reshape(1, D)

    # GatingContext: gating_weights (D,D) + bn1(D)
    gw = jax.random.normal(nk(), (D, D), jnp.float32) / math.sqrt(D)
    gbs, gbb = bn_folded(D)
    gbs, gbb = gbs.reshape(1, D), gbb.reshape(1, D)

    return dict(aw1=aw1, ab1=ab1, aw2=aw2, ab2=ab2, aw3=aw3, ab3=ab3,
                cw=cw, cbs=cbs, cbb=cbb, cw2=cw2, hid=hid,
                b2s=b2s, b2b=b2b, gw=gw, gbs=gbs, gbb=gbb)


# ----------------------------------------------------------------------------
# Pure-JAX reference (same math, same folded params) for correctness checks.
# ----------------------------------------------------------------------------
def ref_forward(x, P):
    hp = jax.lax.Precision.HIGHEST
    B = x.shape[0]
    K = P['cw'].shape[1]
    xt = jnp.swapaxes(x, 1, 2)                                         # (B,N,F)
    h1 = jax.nn.relu(jnp.matmul(xt, P['aw1'], precision=hp) + P['ab1'])
    h2 = jax.nn.relu(jnp.matmul(h1, P['aw2'], precision=hp) + P['ab2'])
    att = jax.nn.sigmoid(jnp.matmul(h2, P['aw3'], precision=hp) + P['ab3'])  # (B,N,1)

    act = jnp.matmul(xt, P['cw'], precision=hp)                        # (B,N,K)
    act = act * P['cbs'] + P['cbb']
    act = jax.nn.softmax(act, axis=-1)
    act = act * att
    a_sum = jnp.sum(act, axis=1, keepdims=True)                        # (B,1,K)
    a = a_sum * P['cw2'][None]                                         # (B,F,K)

    vlad = jnp.einsum('bnk,bnf->bfk', act, xt, precision=hp) - a       # (B,F,K)
    col = jnp.sqrt(jnp.sum(vlad * vlad, axis=1, keepdims=True))
    vlad = vlad / jnp.maximum(col, 1e-12)
    vf = vlad.reshape(B, -1)
    tot = jnp.sqrt(jnp.sum(vf * vf, axis=1, keepdims=True))
    vf = vf / jnp.maximum(tot, 1e-12)

    out = jnp.matmul(vf, P['hid'], precision=hp)
    out = out * P['b2s'] + P['b2b']
    gates = jax.nn.sigmoid(jnp.matmul(out, P['gw'], precision=hp) * P['gbs'] + P['gbb'])
    out = out * gates

    att_out = jnp.broadcast_to(att, (B, att.shape[1], K))
    return out, att_out


if __name__ == "__main__":
    # feature_size=16, max_samples=32, cluster_size=8, output_dim=32
    F, N, K, D = 16, 32, 8, 32

    key = jax.random.PRNGKey(0)
    kx, kp = jax.random.split(key)
    params = init_params(kp, F, K, D)

    # --- main check: batch=2, f32 matmuls ---
    B = 2
    x = jax.random.normal(kx, (B, F, N), dtype=jnp.float32)
    prep_f32 = prepare_params(params, compute_dtype=jnp.float32)
    vlad, att = netvlad_forward(x, prep_f32)
    vlad = jax.block_until_ready(vlad)
    att = jax.block_until_ready(att)
    vlad_ref, att_ref = ref_forward(x, params)
    np.testing.assert_allclose(np.asarray(vlad), np.asarray(vlad_ref), rtol=2e-2, atol=2e-3)
    np.testing.assert_allclose(np.asarray(att), np.asarray(att_ref), rtol=2e-2, atol=2e-3)

    # --- default bf16 matmul operands (v6e/v7x path); accumulation + elementwise f32 ---
    prep_bf16 = prepare_params(params)   # compute_dtype defaults to bfloat16
    vlad_bf, att_bf = netvlad_forward(x, prep_bf16)
    vlad_bf = jax.block_until_ready(vlad_bf)
    att_bf = jax.block_until_ready(att_bf)
    np.testing.assert_allclose(np.asarray(vlad_bf), np.asarray(vlad_ref), rtol=1e-1, atol=5e-2)
    np.testing.assert_allclose(np.asarray(att_bf), np.asarray(att_ref), rtol=1e-1, atol=5e-2)

    # --- multi-block grid + batch-padding path (B=9 -> Bt=5, padded to 10) ---
    B2 = 9
    x2 = jax.random.normal(jax.random.PRNGKey(1), (B2, F, N), dtype=jnp.float32)
    vlad2, att2 = netvlad_forward(x2, prep_f32)
    vlad2 = jax.block_until_ready(vlad2)
    att2 = jax.block_until_ready(att2)
    vlad2_ref, att2_ref = ref_forward(x2, params)
    np.testing.assert_allclose(np.asarray(vlad2), np.asarray(vlad2_ref), rtol=2e-2, atol=2e-3)
    np.testing.assert_allclose(np.asarray(att2), np.asarray(att2_ref), rtol=2e-2, atol=2e-3)

    print("KERNEL_OK")
</pallas_src>

<mosaic_0001>
module attributes {stable_mosaic.version = 11 : i64} {
  func.func @netvlad_core_kernel(%arg0: i32, %arg1: i32, %arg2: memref<1x32x16xf32, #tpu.memory_space<vmem>>, %arg3: memref<16x136xf32, #tpu.memory_space<vmem>>, %arg4: memref<1x128xf32, #tpu.memory_space<vmem>>, %arg5: memref<128x32xf32, #tpu.memory_space<vmem>>, %arg6: memref<1x32xf32, #tpu.memory_space<vmem>>, %arg7: memref<1x32xf32, #tpu.memory_space<vmem>>, %arg8: memref<1x1xf32, #tpu.memory_space<vmem>>, %arg9: memref<1x8xf32, #tpu.memory_space<vmem>>, %arg10: memref<1x8xf32, #tpu.memory_space<vmem>>, %arg11: memref<8x16xf32, #tpu.memory_space<vmem>>, %arg12: memref<1x8x16xf32, #tpu.memory_space<vmem>>, %arg13: memref<1x1x32xf32, #tpu.memory_space<vmem>>, %arg14: memref<1x8x16xf32, #tpu.memory_space<vmem>>, %arg15: memref<1x8xf32, #tpu.memory_space<vmem>>) attributes {dimension_semantics = [#tpu.dimension_semantics<parallel>, #tpu.dimension_semantics<arbitrary>], iteration_bounds = array<i64: 2, 1>, scalar_prefetch = 0 : i64, scratch_operands = 2 : i64, tpu.core_type = #tpu.core_type<tc>, window_params = [{transform_indices = @transform_0, window_bounds = array<i64: 1, 32, 16>}, {pipeline_mode = #tpu.pipeline_mode<synchronous>, transform_indices = @transform_1, window_bounds = array<i64: 16, 136>}, {pipeline_mode = #tpu.pipeline_mode<synchronous>, transform_indices = @transform_2, window_bounds = array<i64: 1, 128>}, {pipeline_mode = #tpu.pipeline_mode<synchronous>, transform_indices = @transform_3, window_bounds = array<i64: 128, 32>}, {pipeline_mode = #tpu.pipeline_mode<synchronous>, transform_indices = @transform_4, window_bounds = array<i64: 1, 32>}, {pipeline_mode = #tpu.pipeline_mode<synchronous>, transform_indices = @transform_5, window_bounds = array<i64: 1, 32>}, {pipeline_mode = #tpu.pipeline_mode<synchronous>, transform_indices = @transform_6, window_bounds = array<i64: 1, 1>}, {pipeline_mode = #tpu.pipeline_mode<synchronous>, transform_indices = @transform_7, window_bounds = array<i64: 1, 8>}, {pipeline_mode = #tpu.pipeline_mode<synchronous>, transform_indices = @transform_8, window_bounds = array<i64: 1, 8>}, {pipeline_mode = #tpu.pipeline_mode<synchronous>, transform_indices = @transform_9, window_bounds = array<i64: 8, 16>}, {transform_indices = @transform_10, window_bounds = array<i64: 1, 8, 16>}, {transform_indices = @transform_11, window_bounds = array<i64: 1, 1, 32>}]} {
    %c0_i32 = arith.constant 0 : i32
    %0 = arith.cmpi eq, %arg1, %c0_i32 : i32
    %1 = arith.extui %0 : i1 to i32
    %c0_i32_0 = arith.constant 0 : i32
    %2 = arith.cmpi ne, %1, %c0_i32_0 : i32
    scf.if %2 {
      %cst_43 = arith.constant 0.000000e+00 : f32
      %66 = vector.broadcast %cst_43 : f32 to vector<1x8x16xf32>
      %c0_44 = arith.constant 0 : index
      %c0_45 = arith.constant 0 : index
      %c0_46 = arith.constant 0 : index
      %67 = vector.load %arg14[%c0_44, %c0_45, %c0_46] : memref<1x8x16xf32, #tpu.memory_space<vmem>>, vector<1x8x16xf32>
      tpu.vector_store %arg14[%c0_44, %c0_45, %c0_46], %66 {strides = array<i32>} : memref<1x8x16xf32, #tpu.memory_space<vmem>>, vector<1x8x16xf32>,
      %cst_47 = arith.constant 0.000000e+00 : f32
      %68 = vector.broadcast %cst_47 : f32 to vector<1x8xf32>
      %c0_48 = arith.constant 0 : index
      %c0_49 = arith.constant 0 : index
      %69 = vector.load %arg15[%c0_48, %c0_49] : memref<1x8xf32, #tpu.memory_space<vmem>>, vector<1x8xf32>
      tpu.vector_store %arg15[%c0_48, %c0_49], %68 {strides = array<i32>} : memref<1x8xf32, #tpu.memory_space<vmem>>, vector<1x8xf32>,
    } else {
    }
    %c0 = arith.constant 0 : index
    %c0_1 = arith.constant 0 : index
    %c0_2 = arith.constant 0 : index
    %3 = vector.load %arg2[%c0, %c0_1, %c0_2] : memref<1x32x16xf32, #tpu.memory_space<vmem>>, vector<1x32x16xf32>
    %4 = vector.shape_cast %3 : vector<1x32x16xf32> to vector<32x16xf32>
    %c0_3 = arith.constant 0 : index
    %c0_4 = arith.constant 0 : index
    %5 = vector.load %arg3[%c0_3, %c0_4] : memref<16x136xf32, #tpu.memory_space<vmem>>, vector<16x136xf32>
    %cst = arith.constant dense<0.000000e+00> : vector<32x136xf32>
    %6 = tpu.matmul %4, %5, %cst {dimension_numbers = #tpu.dot_dimension_numbers<[1], [0], [0], [1], [0, 0, 1, 1], [], []>} : vector<32x16xf32>, vector<16x136xf32>, vector<32x136xf32> -> vector<32x136xf32>
    %7 = vector.extract_strided_slice %6 {offsets = [0, 0], sizes = [32, 128], strides = [1, 1]} : vector<32x136xf32> to vector<32x128xf32>
    %c0_5 = arith.constant 0 : index
    %c0_6 = arith.constant 0 : index
    %8 = vector.load %arg4[%c0_5, %c0_6] : memref<1x128xf32, #tpu.memory_space<vmem>>, vector<1x128xf32>
    %9 = vector.broadcast %8 : vector<1x128xf32> to vector<32x128xf32>
    %10 = arith.addf %7, %9 : vector<32x128xf32>
    %cst_7 = arith.constant 0.000000e+00 : f32
    %11 = vector.broadcast %cst_7 : f32 to vector<32x128xf32>
    %12 = arith.maximumf %10, %11 : vector<32x128xf32>
    %13 = vector.extract_strided_slice %6 {offsets = [0, 128], sizes = [32, 8], strides = [1, 1]} : vector<32x136xf32> to vector<32x8xf32>
    %c0_8 = arith.constant 0 : index
    %c0_9 = arith.constant 0 : index
    %14 = vector.load %arg5[%c0_8, %c0_9] : memref<128x32xf32, #tpu.memory_space<vmem>>, vector<128x32xf32>
    %cst_10 = arith.constant dense<0.000000e+00> : vector<32x32xf32>
    %15 = tpu.matmul %12, %14, %cst_10 {dimension_numbers = #tpu.dot_dimension_numbers<[1], [0], [0], [1], [0, 0, 1, 1], [], []>} : vector<32x128xf32>, vector<128x32xf32>, vector<32x32xf32> -> vector<32x32xf32>
    %c0_11 = arith.constant 0 : index
    %c0_12 = arith.constant 0 : index
    %16 = vector.load %arg6[%c0_11, %c0_12] : memref<1x32xf32, #tpu.memory_space<vmem>>, vector<1x32xf32>
    %17 = vector.broadcast %16 : vector<1x32xf32> to vector<32x32xf32>
    %18 = arith.addf %15, %17 : vector<32x32xf32>
    %cst_13 = arith.constant 0.000000e+00 : f32
    %19 = vector.broadcast %cst_13 : f32 to vector<32x32xf32>
    %20 = arith.maximumf %18, %19 : vector<32x32xf32>
    %c0_14 = arith.constant 0 : index
    %c0_15 = arith.constant 0 : index
    %21 = vector.load %arg7[%c0_14, %c0_15] : memref<1x32xf32, #tpu.memory_space<vmem>>, vector<1x32xf32>
    %22 = vector.broadcast %21 : vector<1x32xf32> to vector<32x32xf32>
    %23 = arith.mulf %20, %22 : vector<32x32xf32>
    %cst_16 = arith.constant dense<0.000000e+00> : vector<32xf32>
    %24 = vector.multi_reduction <add>, %23, %cst_16 [1] : vector<32x32xf32> to vector<32xf32>
    %25 = vector.shape_cast %24 : vector<32xf32> to vector<32x1xf32>
    %c0_17 = arith.constant 0 : index
    %c0_18 = arith.constant 0 : index
    %26 = vector.load %arg8[%c0_17, %c0_18] : memref<1x1xf32, #tpu.memory_space<vmem>>, vector<1x1xf32>
    %27 = vector.broadcast %26 : vector<1x1xf32> to vector<32x1xf32>
    %28 = arith.addf %25, %27 : vector<32x1xf32>
    %29 = arith.negf %28 : vector<32x1xf32>
    %30 = math.exp %29 : vector<32x1xf32>
    %cst_19 = arith.constant 1.000000e+00 : f32
    %31 = vector.broadcast %cst_19 : f32 to vector<32x1xf32>
    %32 = arith.addf %31, %30 : vector<32x1xf32>
    %33 = arith.divf %31, %32 : vector<32x1xf32>
    %c0_20 = arith.constant 0 : index
    %c0_21 = arith.constant 0 : index
    %34 = vector.load %arg9[%c0_20, %c0_21] : memref<1x8xf32, #tpu.memory_space<vmem>>, vector<1x8xf32>
    %35 = vector.broadcast %34 : vector<1x8xf32> to vector<32x8xf32>
    %36 = arith.mulf %13, %35 : vector<32x8xf32>
    %c0_22 = arith.constant 0 : index
    %c0_23 = arith.constant 0 : index
    %37 = vector.load %arg10[%c0_22, %c0_23] : memref<1x8xf32, #tpu.memory_space<vmem>>, vector<1x8xf32>
    %38 = vector.broadcast %37 : vector<1x8xf32> to vector<32x8xf32>
    %39 = arith.addf %36, %38 : vector<32x8xf32>
    %cst_24 = arith.constant dense<0xFF800000> : vector<32xf32>
    %40 = vector.multi_reduction <maximumf>, %39, %cst_24 [1] : vector<32x8xf32> to vector<32xf32>
    %41 = vector.shape_cast %40 : vector<32xf32> to vector<32x1xf32>
    %42 = vector.broadcast %41 : vector<32x1xf32> to vector<32x8xf32>
    %43 = arith.subf %39, %42 : vector<32x8xf32>
    %44 = math.exp %43 : vector<32x8xf32>
    %cst_25 = arith.constant dense<0.000000e+00> : vector<32xf32>
    %45 = vector.multi_reduction <add>, %44, %cst_25 [1] : vector<32x8xf32> to vector<32xf32>
    %46 = vector.shape_cast %45 : vector<32xf32> to vector<32x1xf32>
    %47 = tpu.reciprocal %46 : vector<32x1xf32> -> vector<32x1xf32>
    %48 = vector.broadcast %47 : vector<32x1xf32> to vector<32x8xf32>
    %49 = arith.mulf %44, %48 : vector<32x8xf32>
    %50 = vector.broadcast %33 : vector<32x1xf32> to vector<32x8xf32>
    %51 = arith.mulf %49, %50 : vector<32x8xf32>
    %52 = vector.shape_cast %51 : vector<32x8xf32> to vector<1x32x8xf32>
    %c0_26 = arith.constant 0 : index
    %c0_27 = arith.constant 0 : index
    %53 = vector.load %arg15[%c0_26, %c0_27] : memref<1x8xf32, #tpu.memory_space<vmem>>, vector<1x8xf32>
    %cst_28 = arith.constant dense<0.000000e+00> : vector<1x8xf32>
    %54 = vector.multi_reduction <add>, %52, %cst_28 [1] : vector<1x32x8xf32> to vector<1x8xf32>
    %55 = arith.addf %53, %54 : vector<1x8xf32>
    %c0_29 = arith.constant 0 : index
    %c0_30 = arith.constant 0 : index
    %56 = vector.load %arg15[%c0_29, %c0_30] : memref<1x8xf32, #tpu.memory_space<vmem>>, vector<1x8xf32>
    tpu.vector_store %arg15[%c0_29, %c0_30], %55 {strides = array<i32>} : memref<1x8xf32, #tpu.memory_space<vmem>>, vector<1x8xf32>,
    %c0_31 = arith.constant 0 : index
    %c0_32 = arith.constant 0 : index
    %c0_33 = arith.constant 0 : index
    %57 = vector.load %arg14[%c0_31, %c0_32, %c0_33] : memref<1x8x16xf32, #tpu.memory_space<vmem>>, vector<1x8x16xf32>
    "tpu.trace_start"() <{level = 10 : i32, message = "bnk,bnf->bkf"}> : () -> ()
    %cst_34 = arith.constant dense<0.000000e+00> : vector<1x8x16xf32>
    %58 = tpu.matmul %52, %3, %cst_34 {dimension_numbers = #tpu.dot_dimension_numbers<[1], [1], [2], [2], [0, 0, 0, 2, 1, 2], [0], [0]>} : vector<1x32x8xf32>, vector<1x32x16xf32>, vector<1x8x16xf32> -> vector<1x8x16xf32>
    "tpu.trace_stop"() : () -> ()
    %59 = arith.addf %57, %58 : vector<1x8x16xf32>
    %c0_35 = arith.constant 0 : index
    %c0_36 = arith.constant 0 : index
    %c0_37 = arith.constant 0 : index
    %60 = vector.load %arg14[%c0_35, %c0_36, %c0_37] : memref<1x8x16xf32, #tpu.memory_space<vmem>>, vector<1x8x16xf32>
    tpu.vector_store %arg14[%c0_35, %c0_36, %c0_37], %59 {strides = array<i32>} : memref<1x8x16xf32, #tpu.memory_space<vmem>>, vector<1x8x16xf32>,
    %61 = vector.shape_cast %33 : vector<32x1xf32> to vector<1x1x32xf32>
    %c0_38 = arith.constant 0 : index
    %c0_39 = arith.constant 0 : index
    %c0_40 = arith.constant 0 : index
    %62 = vector.load %arg13[%c0_38, %c0_39, %c0_40] : memref<1x1x32xf32, #tpu.memory_space<vmem>>, vector<1x1x32xf32>
    tpu.vector_store %arg13[%c0_38, %c0_39, %c0_40], %61 {strides = array<i32>} : memref<1x1x32xf32, #tpu.memory_space<vmem>>, vector<1x1x32xf32>,
    %c0_i32_41 = arith.constant 0 : i32
    %63 = arith.cmpi eq, %arg1, %c0_i32_41 : i32
    %64 = arith.extui %63 : i1 to i32
    %c0_i32_42 = arith.constant 0 : i32
    %65 = arith.cmpi ne, %64, %c0_i32_42 : i32
    scf.if %65 {
      %c0_43 = arith.constant 0 : index
      %c0_44 = arith.constant 0 : index
      %66 = vector.load %arg15[%c0_43, %c0_44] : memref<1x8xf32, #tpu.memory_space<vmem>>, vector<1x8xf32>
      %67 = vector.shape_cast %66 : vector<1x8xf32> to vector<1x8x1xf32>
      %c0_45 = arith.constant 0 : index
      %c0_46 = arith.constant 0 : index
      %68 = vector.load %arg11[%c0_45, %c0_46] : memref<8x16xf32, #tpu.memory_space<vmem>>, vector<8x16xf32>
      %69 = vector.shape_cast %68 : vector<8x16xf32> to vector<1x8x16xf32>
      %70 = vector.broadcast %67 : vector<1x8x1xf32> to vector<1x8x16xf32>
      %71 = arith.mulf %70, %69 : vector<1x8x16xf32>
      %c0_47 = arith.constant 0 : index
      %c0_48 = arith.constant 0 : index
      %c0_49 = arith.constant 0 : index
      %72 = vector.load %arg14[%c0_47, %c0_48, %c0_49] : memref<1x8x16xf32, #tpu.memory_space<vmem>>, vector<1x8x16xf32>
      %73 = arith.subf %72, %71 : vector<1x8x16xf32>
      %74 = arith.mulf %73, %73 : vector<1x8x16xf32>
      %cst_50 = arith.constant dense<0.000000e+00> : vector<1x8xf32>
      %75 = vector.multi_reduction <add>, %74, %cst_50 [2] : vector<1x8x16xf32> to vector<1x8xf32>
      %76 = vector.shape_cast %75 : vector<1x8xf32> to vector<1x8x1xf32>
      %cst_51 = arith.constant 1.000000e-24 : f32
      %77 = vector.broadcast %cst_51 : f32 to vector<1x8x1xf32>
      %78 = arith.maximumf %76, %77 : vector<1x8x1xf32>
      %79 = math.rsqrt %78 : vector<1x8x1xf32>
      %80 = arith.mulf %79, %79 : vector<1x8x1xf32>
      %81 = arith.mulf %76, %80 : vector<1x8x1xf32>
      %cst_52 = arith.constant dense<0.000000e+00> : vector<1x1xf32>
      %82 = vector.multi_reduction <add>, %81, %cst_52 [1] : vector<1x8x1xf32> to vector<1x1xf32>
      %83 = vector.shape_cast %82 : vector<1x1xf32> to vector<1x1x1xf32>
      %cst_53 = arith.constant 1.000000e-24 : f32
      %84 = vector.broadcast %cst_53 : f32 to vector<1x1x1xf32>
      %85 = arith.maximumf %83, %84 : vector<1x1x1xf32>
      %86 = math.rsqrt %85 : vector<1x1x1xf32>
      %87 = vector.broadcast %86 : vector<1x1x1xf32> to vector<1x8x1xf32>
      %88 = arith.mulf %79, %87 : vector<1x8x1xf32>
      %89 = vector.broadcast %88 : vector<1x8x1xf32> to vector<1x8x16xf32>
      %90 = arith.mulf %73, %89 : vector<1x8x16xf32>
      %c0_54 = arith.constant 0 : index
      %c0_55 = arith.constant 0 : index
      %c0_56 = arith.constant 0 : index
      %91 = vector.load %arg12[%c0_54, %c0_55, %c0_56] : memref<1x8x16xf32, #tpu.memory_space<vmem>>, vector<1x8x16xf32>
      tpu.vector_store %arg12[%c0_54, %c0_55, %c0_56], %90 {strides = array<i32>} : memref<1x8x16xf32, #tpu.memory_space<vmem>>, vector<1x8x16xf32>,
    } else {
    }
    return
  }
  func.func @transform_0(%arg0: i32, %arg1: i32) -> (i32, i32, i32) {
    %c0_i32 = arith.constant 0 : i32
    %c0_i32_0 = arith.constant 0 : i32
    return %arg0, %arg1, %c0_i32 : i32, i32, i32
  }
  func.func @transform_1(%arg0: i32, %arg1: i32) -> (i32, i32) {
    %c0_i32 = arith.constant 0 : i32
    %c0_i32_0 = arith.constant 0 : i32
    %c0_i32_1 = arith.constant 0 : i32
    return %c0_i32, %c0_i32_0 : i32, i32
  }
  func.func @transform_2(%arg0: i32, %arg1: i32) -> (i32, i32) {
    %c0_i32 = arith.constant 0 : i32
    %c0_i32_0 = arith.constant 0 : i32
    %c0_i32_1 = arith.constant 0 : i32
    return %c0_i32, %c0_i32_0 : i32, i32
  }
  func.func @transform_3(%arg0: i32, %arg1: i32) -> (i32, i32) {
    %c0_i32 = arith.constant 0 : i32
    %c0_i32_0 = arith.constant 0 : i32
    %c0_i32_1 = arith.constant 0 : i32
    return %c0_i32, %c0_i32_0 : i32, i32
  }
  func.func @transform_4(%arg0: i32, %arg1: i32) -> (i32, i32) {
    %c0_i32 = arith.constant 0 : i32
    %c0_i32_0 = arith.constant 0 : i32
    %c0_i32_1 = arith.constant 0 : i32
    return %c0_i32, %c0_i32_0 : i32, i32
  }
  func.func @transform_5(%arg0: i32, %arg1: i32) -> (i32, i32) {
    %c0_i32 = arith.constant 0 : i32
    %c0_i32_0 = arith.constant 0 : i32
    %c0_i32_1 = arith.constant 0 : i32
    return %c0_i32, %c0_i32_0 : i32, i32
  }
  func.func @transform_6(%arg0: i32, %arg1: i32) -> (i32, i32) {
    %c0_i32 = arith.constant 0 : i32
    %c0_i32_0 = arith.constant 0 : i32
    %c0_i32_1 = arith.constant 0 : i32
    return %c0_i32, %c0_i32_0 : i32, i32
  }
  func.func @transform_7(%arg0: i32, %arg1: i32) -> (i32, i32) {
    %c0_i32 = arith.constant 0 : i32
    %c0_i32_0 = arith.constant 0 : i32
    %c0_i32_1 = arith.constant 0 : i32
    return %c0_i32, %c0_i32_0 : i32, i32
  }
  func.func @transform_8(%arg0: i32, %arg1: i32) -> (i32, i32) {
    %c0_i32 = arith.constant 0 : i32
    %c0_i32_0 = arith.constant 0 : i32
    %c0_i32_1 = arith.constant 0 : i32
    return %c0_i32, %c0_i32_0 : i32, i32
  }
  func.func @transform_9(%arg0: i32, %arg1: i32) -> (i32, i32) {
    %c0_i32 = arith.constant 0 : i32
    %c0_i32_0 = arith.constant 0 : i32
    %c0_i32_1 = arith.constant 0 : i32
    return %c0_i32, %c0_i32_0 : i32, i32
  }
  func.func @transform_10(%arg0: i32, %arg1: i32) -> (i32, i32, i32) {
    %c0_i32 = arith.constant 0 : i32
    %c0_i32_0 = arith.constant 0 : i32
    %c0_i32_1 = arith.constant 0 : i32
    return %arg0, %c0_i32, %c0_i32_0 : i32, i32, i32
  }
  func.func @transform_11(%arg0: i32, %arg1: i32) -> (i32, i32, i32) {
    %c0_i32 = arith.constant 0 : i32
    %c0_i32_0 = arith.constant 0 : i32
    return %arg0, %c0_i32, %arg1 : i32, i32, i32
  }
}

</mosaic_0001>

<bundles_post_ra>
// kernel: tpu_custom_call.1
= control target key start
LH: loop header
LB: loop body
LE: loop exit
PB: predicated region body
PF: predicated region fallthrough
CT: control target
= control target key end

     0   :  { %s1865_s0 = inlined_call_operand.vmem [shape: f32[2,32,16], index: 0, kind: input, shape index: {}]   ;;  %s1866_s1 = inlined_call_operand.vmem [shape: f32[16,136], index: 1, kind: input, shape index: {}]   ;;  %s1867_s2 = inlined_call_operand.vmem [shape: f32[1,128], index: 2, kind: input, shape index: {}]   ;;  %s1868_s3 = inlined_call_operand.vmem [shape: f32[128,32], index: 3, kind: input, shape index: {}]   ;;  %s1869_s4 = inlined_call_operand.vmem [shape: f32[1,32], index: 4, kind: input, shape index: {}]   ;;  %s1870_s5 = inlined_call_operand.vmem [shape: f32[1,32], index: 5, kind: input, shape index: {}]   ;;  %s1871_s6 = inlined_call_operand.<no memory space> [shape: f32[1,1], index: 6, kind: input, shape index: {}]   ;;  %s1872_s7 = inlined_call_operand.vmem [shape: f32[1,8], index: 7, kind: input, shape index: {}]   ;;  %s1873_s8 = inlined_call_operand.vmem [shape: f32[1,8], index: 8, kind: input, shape index: {}]   ;;  %s1874_s9 = inlined_call_operand.vmem [shape: f32[8,16], index: 9, kind: input, shape index: {}]   ;;  %s1875_s10 = inlined_call_operand.hbm [shape: f32[2,8,16], index: 10, kind: output, shape index: {0}]   ;;  %s1876_s11 = inlined_call_operand.hbm [shape: f32[2,1,32], index: 11, kind: output, shape index: {1}]  }
   0x1   :  { %1877 = sst [smem:[#allocation11_spill]] %s1865_s0  ;;  %v17_v0 = vstv %s1871_s6 }
   0x2   :  { %1878 = sst [smem:[#allocation12_spill]] %s1866_s1  ;;  %18 = vst [vmem:[#allocation4] sm:$0x1] %v17_v0 }
   0x3   :  { %19 = vsyncpa [#allocation6], 0 }
   0x4   :  { %21 = vsyncpa [#allocation6 + $0x1], 0 }
   0x5   :  { %22 = vsyncpa [#allocation8], 0 }
   0x6   :  { %24 = vsyncpa [#allocation8 + $0x1], 0  ;;  %s1574_s19 = smov 0   ;;  %s1576_s20 = smov 0  }
   0x7   :  { %s1578_s21 = smov 0   ;;  %s1580_s22 = smov 0  }
   0x8   :  { %s1582_s23 = smov 0   ;;  %s1584_s24 = smov 0  }
   0x9 LB: > { %s1145_s6 = sadd.s32 4294967295, %s1503_s24   ;;  %s1146_s25 = sadd.s32 4294967294, %s1503_s24   ;;  %s1503_s24 = sphi %s1584_s24, %s30_s24   ;;  %s1499_s23 = sphi %s1582_s23, %s1887_s23   ;;  %s1495_s22 = sphi %s1580_s22, %s1886_s22   ;;  %s1491_s21 = sphi %s1578_s21, %s1885_s21   ;;  %s1487_s20 = sphi %s1576_s20, %s1884_s20   ;;  %s1483_s19 = sphi %s1574_s19, %s1883_s19  }
   0xa   : > { %s42_s26 = sadd.s32 1, %s1499_s23  ;;  %s266_s27 = sadd.s32 1, %s1491_s21 }
   0xb   : > { %p44_p0 = scmp.ge.s32.totalorder %s42_s26, 2  ;;  %p276_p1 = scmp.ne.s32.totalorder %s1491_s21, %s1487_s20 }
   0xc   : > { %p277_p2 = scmp.eq.s32.totalorder %s1145_s6, 1  ;;  %p282_p3 = scmp.ne.s32.totalorder %s1487_s20, %s1483_s19 }
   0xd   : > { %s1889_s26 = smov (%p44_p0, %s42_s26), 0  ;;  %p283_p5 = scmp.eq.s32.totalorder %s1146_s25, 1 }
   0xe   : > { %p1614_p4 = por %p277_p2, %p276_p1  ;;  %s263_s29 = ssub.s32 %s1499_s23, %s1889_s26 }
   0xf   : > { %p1149_p6 = scmp.ge.s32.totalorder %s1503_s24, 1  ;;  %p264_p7 = scmp.eq.s32.totalorder %s263_s29, 0 }
  0x10   : > { %p1621_p8 = por %p283_p5, %p282_p3  ;;  %p369_p9 = scmp.lt.s32.totalorder %s1503_s24, 3 }
  0x11   : > { %s1627_s12 = scalar_select %p264_p7, %s1491_s21, %s266_s27  }
  0x12   : > { %p370_p10 = pnand %p1149_p6, %p369_p9 }
  0x13   : > { %s1881_s1 = sld [smem:[#allocation12_spill]] (!%p370_p10)  ;;  %p418_p11 = scmp.lt.s32.totalorder (!%p370_p10), %s1495_s22, 1  ;;  %vm431_vm0 = vcmask (!%p370_p10), 130048   ;;  %v1505_v6 = vmov (!%p370_p10), 0.0   ;;  %v560_v7 = vld [vmem:[%s1868_s3] sm:$0xff] (!%p370_p10)  ;;  %v561_v8 = vld [vmem:[%s1868_s3 + $0x8] sm:$0xff] (!%p370_p10) }
  0x14   : > { %373 = sbr.rel (%p370_p10) target bundleno = 1330 (0x532), region = 60  ;;  %520 = vmatprep.mubr.f32.mxu0 (!%p370_p10), %v1505_v6  ;;  %432 = vst.msk [vmem:[#allocation2] sm:$0xff] (!%p370_p10), %vm431_vm0, %v1505_v6  ;;  %v1253_v10 = vpack.c.bf16 (!%p370_p10), %v561_v8, %v560_v7  ;;  %v562_v11 = vld [vmem:[%s1868_s3 + $0x10] sm:$0xff] (!%p370_p10)  ;;  %v563_v12 = vld [vmem:[%s1868_s3 + $0x18] sm:$0xff] (!%p370_p10)  ;;  %v564_v14 = vld [vmem:[%s1868_s3 + $0x20] sm:$0xff] (!%p370_p10)  ;;  %s1882_s0 = sld [smem:[#allocation11_spill]] (!%p370_p10) }
  0x15   : > { %v1257_v13 = vpack.c.bf16 (!%p370_p10), %v563_v12, %v562_v11  ;;  %v565_v15 = vld [vmem:[%s1868_s3 + $0x28] sm:$0xff] (!%p370_p10)  ;;  %v566_v19 = vld [vmem:[%s1868_s3 + $0x30] sm:$0xff] (!%p370_p10)  ;;  %v567_v23 = vld [vmem:[%s1868_s3 + $0x38] sm:$0xff] (!%p370_p10)  ;;  %vm753_vm1 = vcmask (!%p370_p10), 64512   ;;  %vm683_vm2 = vcmask (!%p370_p10), 261120   ;;  %vm433_vm3 = vcmask (!%p370_p10), 57344  }
  0x16   : > { %1254 = vmatprep.subr.bf16.mxu1 (!%p370_p10), %v1253_v10  ;;  %v1261_v18 = vpack.c.bf16 (!%p370_p10), %v565_v15, %v564_v14  ;;  %v1265_v25 = vpack.c.bf16 (!%p370_p10), %v567_v23, %v566_v19  ;;  %v568_v26 = vld [vmem:[%s1868_s3 + $0x40] sm:$0xff] (!%p370_p10)  ;;  %v569_v27 = vld [vmem:[%s1868_s3 + $0x48] sm:$0xff] (!%p370_p10)  ;;  %v570_v29 = vld [vmem:[%s1868_s3 + $0x50] sm:$0xff] (!%p370_p10)  ;;  %434 = vst.msk [vmem:[#allocation3] sm:$0x1] (!%p370_p10), %vm433_vm3, %v1505_v6  ;;  %vm1508_vm4 = vmmov (!%p370_p10), 0  }
  0x17   : > { %1256 = vmatpush3.bf16.msra.mxu1 (!%p370_p10), %v1253_v10  ;;  %v1269_v28 = vpack.c.bf16 (!%p370_p10), %v569_v27, %v568_v26  ;;  %v571_v30 = vld [vmem:[%s1868_s3 + $0x58] sm:$0xff] (!%p370_p10)  ;;  %v572_v32 = vld [vmem:[%s1868_s3 + $0x60] sm:$0xff] (!%p370_p10)  ;;  %v573_v33 = vld [vmem:[%s1868_s3 + $0x68] sm:$0xff] (!%p370_p10)  ;;  %vm958_vm5 = vcmask (!%p370_p10), 130112   ;;  %vm965_vm6 = vcmask (!%p370_p10), 195712   ;;  %vm972_vm7 = vcmask (!%p370_p10), 261312  }
  0x18   : > { %1258 = vmatprep.subr.bf16.mxu1 (!%p370_p10), %v1257_v13  ;;  %v1273_v31 = vpack.c.bf16 (!%p370_p10), %v571_v30, %v570_v29  ;;  %v1277_v34 = vpack.c.bf16 (!%p370_p10), %v573_v33, %v572_v32  ;;  %v574_v35 = vld [vmem:[%s1868_s3 + $0x70] sm:$0xff] (!%p370_p10)  ;;  %v575_v36 = vld [vmem:[%s1868_s3 + $0x78] sm:$0xff] (!%p370_p10)  ;;  %v1157_v38 = vld [vmem:[%s1867_s2] ss:$0 sm:$0xff] (!%p370_p10)  ;;  %vm975_vm8 = vcmask (!%p370_p10), 253952   ;;  %s1171_s6 = sshll.u32 (!%p370_p10), %s1495_s22, 4 }
  0x19   : > { %v440_v1 = vld [vmem:[%s1881_s1 + $0x8] sm:$0xff] (!%p370_p10)  ;;  %v442_v2 = vld [vmem:[%s1881_s1 + $0x18] sm:$0xff] (!%p370_p10)  ;;  %v439_v3 = vld [vmem:[%s1881_s1] sm:$0xff] (!%p370_p10)  ;;  %v1281_v37 = vpack.c.bf16 (!%p370_p10), %v575_v36, %v574_v35  ;;  %s1791_s27 = scalar_lea.hbm (!%p370_p10), %s1876_s11, %s1171_s6 }
  0x1a   : > { %v1249_v4 = vpack.c.bf16 (!%p370_p10), %v442_v2, %v440_v1  ;;  %v441_v5 = vld [vmem:[%s1881_s1 + $0x10] sm:$0xff] (!%p370_p10)  ;;  %v1165_v39 = vld [vmem:[%s1872_s7] ss:$0 sm:$0xff] (!%p370_p10) }
  0x1b   : > { %v1251_v9 = vpack.c.bf16 %v441_v5, %v439_v3  ;;  %s419_s15 = scalar_select %p418_p11, %s1495_s22, 1  ;;  %1260 = vmatpush3.bf16.msra.mxu1 %v1257_v13  ;;  %v1166_v43 = vld [vmem:[%s1873_s8] ss:$0 sm:$0xff] }
  0x1c   : > { %1250 = vmatprep.subr.bf16.mxu0 %v1249_v4  ;;  %1262 = vmatprep.subr.bf16.mxu1 %v1261_v18  ;;  %v1158_v10 = vld [vmem:[%s1869_s4] ss:$0 sm:$0xff] }
  0x1d   : > { %1252 = vmatpush1.bf16.msra.mxu0 %v1251_v9  ;;  %s1174_s14 = sshll.u32 %s419_s15, 5 }
  0x1e   : > { %s425_s17 = scalar_lea.vmem %s1882_s0, %s1174_s14  ;;  %s1774_s14 = sand.u32 1, %s1487_s20  }
  0x1f   : > { %v1667_v16 = vld [vmem:[%s425_s17] sm:$0xff]  ;;  %v1669_v17 = vld [vmem:[%s425_s17 + $0x8] sm:$0xff]  ;;  %v1678_v21 = vld [vmem:[%s425_s17 + $0x10] sm:$0xff]  ;;  %1264 = vmatpush3.bf16.msra.mxu1 %v1261_v18  ;;  %s416_s16 = scalar_lea.vmem [#allocation7], %s1774_s14  ;;  %s1017_s29 = scalar_lea.sflag [#allocation8], %s1774_s14 }
  0x20   : > { %1153 = vmatmul.mubr.msk.f32.vlgmr.msra.gmra.mrb[0].mxu0 %vm431_vm0, %v1667_v16  ;;  %v1286_v20 = vpack.c.bf16 %v1669_v17, %v1667_v16  ;;  %v1680_v22 = vld [vmem:[%s425_s17 + $0x18] sm:$0xff]  ;;  %1266 = vmatprep.subr.bf16.mxu1 %v1265_v25  ;;  %s1043_s1 = sshll.u32 %s416_s16, 4  ;;  %s1509_s17 = smov [#allocation7]   ;;  %s1044_s1 = int_to_ptr.vmem [resolvable:$true] %s1043_s1 }
  0x21   : > { %526 = vmatprep.mubr.f32.mxu0 %v1505_v6  ;;  %v1289_v24 = vpack.c.bf16 %v1680_v22, %v1678_v21  ;;  %s1393_s13 = scalar_lea.vmem %s1044_s1, 16  ;;  %s1397_s18 = sshll.u32 %s1509_s17, 4  ;;  %s1398_s18 = int_to_ptr.vmem [resolvable:$false] %s1397_s18 }
  0x22   : > { %p1394_p12 = scmp.ne.s32.totalorder %s1044_s1, %s1393_s13  ;;  %s1399_s0 = scalar_lea.vmem %s1398_s18, 32 }
  0x23   : > { %1268 = vmatpush3.bf16.msra.mxu1 %v1265_v25  ;;  %v1159_v25 = vld [vmem:[%s1870_s5] ss:$0 sm:$0xff]  ;;  %p1400_p1 = scmp.lt.s32.totalorder %s1044_s1, %s1398_s18  ;;  %p1401_p2 = scmp.lt.s32.totalorder %s1399_s0, %s1393_s13 }
  0x24   : > { %1154 = vmatmul.mubr.msk.f32.gmra.mrb[2].mxu0 %vm431_vm0, %v1669_v17  ;;  %1270 = vmatprep.subr.bf16.mxu1 %v1269_v28  ;;  %p1395_p13 = pnand %p1394_p12, %p1614_p4 }
  0x25   : > { %532 = vmatprep.mubr.f32.mxu0 %v1505_v6  ;;  %p1402_p3 = por %p1401_p2, %p1400_p1 }
  0x26   : > { %p1396_p0 = pneg %p1395_p13 }
  0x27   : > { %1272 = vmatpush3.bf16.msra.mxu1 %v1269_v28 }
  0x28   : > { %1155 = vmatmul.mubr.msk.f32.gmra.mrb[4].mxu0 %vm431_vm0, %v1678_v21  ;;  %1274 = vmatprep.subr.bf16.mxu1 %v1273_v31  ;;  %p1403_p5 = pnand %p1402_p3, %p1396_p0 }
  0x29   : > { %538 = vmatprep.mubr.f32.mxu0 %v1505_v6 }
  0x2b   : > { %1276 = vmatpush3.bf16.msra.mxu1 %v1273_v31 }
  0x2c   : > { %1156 = vmatmul.mubr.msk.f32.gmra.mrb[6].mxu0 %vm431_vm0, %v1680_v22  ;;  %1278 = vmatprep.subr.bf16.mxu1 %v1277_v34 }
  0x2d   : > { %1246 = vmatprep.mubr.msk.f32.mxu0 %vm1508_vm4, %v1505_v6 }
  0x2f   : > { %1280 = vmatpush3.bf16.msra.mxu1 %v1277_v34 }
  0x30   : > { %1282 = vmatprep.subr.bf16.mxu1 %v1281_v37 }
  0x33   : > { %1284 = vmatpush3.bf16.msra.mxu1 %v1281_v37 }
  0xf3   : > { %v522_v40 = vpop.f32.mrb[0].mxu0 }
  0xf4   : > { %v524_v41 = vpop.f32.mrb[1].mxu0  ;;  %v552_v42 = vadd.f32 %v1157_v38, %v522_v40 }
  0xf5   : > { %v738_v44 = vmul.f32 %v1165_v39, %v524_v41 }
  0xf6   : > { %v556_v45 = vmax.f32 %v552_v42, 0.0 }
  0xf7   : > { %v528_v46 = vpop.f32.mrb[2].mxu0  ;;  %v749_v47 = vadd.f32 %v1166_v43, %v738_v44 }
  0xf8   : > { %v553_v48 = vadd.f32 %v1157_v38, %v528_v46  ;;  %v530_v49 = vpop.f32.mrb[3].mxu0  ;;  %1232 = vmatprep.mubr.f32.mxu1 %v556_v45 }
  0xf9   : > { %v739_v50 = vmul.f32 %v1165_v39, %v530_v49  ;;  %v754_v51 = vsel %vm753_vm1, %v749_v47, -inf }
  0xfa   : > { %v557_v52 = vmax.f32 %v553_v48, 0.0  ;;  %755 = vmax.xlane.f32.xlu0 %v754_v51 }
  0xfb   : > { %v534_v53 = vpop.f32.mrb[4].mxu0  ;;  %v750_v54 = vadd.f32 %v1166_v43, %v739_v50 }
  0xfc   : > { %v554_v55 = vadd.f32 %v1157_v38, %v534_v53  ;;  %v536_v56 = vpop.f32.mrb[5].mxu0  ;;  %1233 = vmatmul.mubr.f32.vlgmr.msra.gmra.mrb[0].mxu1 %v557_v52 }
  0xfd   : > { %v740_v57 = vmul.f32 %v1165_v39, %v536_v56  ;;  %v757_v58 = vsel %vm753_vm1, %v750_v54, -inf }
  0xfe   : > { %v558_v59 = vmax.f32 %v554_v55, 0.0  ;;  %758 = vmax.xlane.f32.xlu0 %v757_v58  ;;  %v1160_v55 = vld [vmem:[#allocation4] ss:$0 sm:$0xff] }
  0xff   : > { %v540_v60 = vpop.f32.mrb[6].mxu0  ;;  %v751_v61 = vadd.f32 %v1166_v43, %v740_v57 }
 0x100   : > { %v555_v62 = vadd.f32 %v1157_v38, %v540_v60  ;;  %v542_v63 = vpop.f32.mrb[7].mxu0  ;;  %1235 = vmatprep.mubr.f32.mxu1 %v558_v59 }
 0x101   : > { %v741_v0 = vmul.f32 %v1165_v39, %v542_v63  ;;  %v760_v1 = vsel %vm753_vm1, %v751_v61, -inf }
 0x102   : > { %v559_v2 = vmax.f32 %v555_v62, 0.0  ;;  %761 = vmax.xlane.f32.xlu1 %v760_v1 }
 0x103   : > { %v752_v3 = vadd.f32 %v1166_v43, %v741_v0 }
 0x104   : > { %1236 = vmatmul.mubr.f32.gmra.mrb[2].mxu1 %v559_v2 }
 0x105   : > { %v763_v4 = vsel %vm753_vm1, %v752_v3, -inf }
 0x106   : > { %764 = vmax.xlane.f32.xlu1 %v763_v4 }
 0x187   : > { %v756_v5 = vpop.xlane.xlu0 %755 }
 0x188   : > { %v766_v11 = vsub.f32 %v749_v47, %v756_v5 }
 0x18a   : > { %v770_v26 = vmul.f32 1.442695, %v766_v11 }
 0x18b   : > { %v759_v8 = vpop.xlane.xlu0 %758 }
 0x18c   : > { %v767_v9 = vsub.f32 %v750_v54, %v759_v8  ;;  %v1506_v54 = vmov 0  }
 0x18d   : > { %1356 = vset.pattern.permute.xlu1 %v1506_v54  ;;  %1355 = vset.pattern.permute.xlu0 %v1506_v54 }
 0x18e   : > { %v772_v18 = vmul.f32 1.442695, %v767_v9 }
 0x18f   : > { %v762_v7 = vpop.xlane.xlu1 %761 }
 0x190   : > { %v768_v27 = vsub.f32 %v751_v61, %v762_v7  ;;  %1357 = vpow2.f32 %v772_v18 }
 0x191   : > { %1359 = vpow2.f32 %v770_v26 }
 0x192   : > { %v774_v33 = vmul.f32 1.442695, %v768_v27  ;;  %v947_v27 = vlaneseq }
 0x193   : > { %v765_v12 = vpop.xlane.xlu1 %764 }
 0x194   : > { %v769_v19 = vsub.f32 %v752_v3, %v765_v12  ;;  %v950_v17 = vshrl.u32 %v947_v27, 7 }
 0x196   : > { %v776_v31 = vmul.f32 1.442695, %v769_v19  ;;  %v1507_v19 = vmov 0.0|0.0  }
 0x197   : > { %1285 = vmatprep.subr.bf16.mxu0 %v1507_v19 }
 0x198   : > { %1361 = vpow2.f32 %v776_v31  ;;  %1287 = vmatpush3.bf16.msra.mxu0 %v1286_v20 }
 0x199   : > { %1363 = vpow2.f32 %v774_v33  ;;  %1288 = vmatprep.subr.bf16.mxu0 %v1507_v19 }
 0x19a   : > { %v1742_v45 = vpop.eup %1357 }
 0x19b   : > { %v1745_v47 = vpop.eup %1359  ;;  %v781_v48 = vsel %vm753_vm1, %v1742_v45, 0.0 }
 0x19c   : > { %v778_v50 = vsel %vm753_vm1, %v1745_v47, 0.0  ;;  %1290 = vmatpush3.bf16.msra.mxu0 %v1289_v24 }
 0x1a2   : > { %v1749_v49 = vpop.eup %1361 }
 0x1a3   : > { %v1753_v51 = vpop.eup %1363  ;;  %v787_v52 = vsel %vm753_vm1, %v1749_v49, 0.0 }
 0x1a4   : > { %v784_v53 = vsel %vm753_vm1, %v1753_v51, 0.0 }
 0x1cf   : > { %v1234_v13 = vpop.f32.mrb[0].mxu1 }
 0x1d0   : > { %v655_v14 = vadd.f32 %v1234_v13, %v1158_v10  ;;  %v649_v15 = vpop.f32.mrb[1].mxu1 }
 0x1d1   : > { %v650_v23 = vadd.f32 %v1158_v10, %v649_v15 }
 0x1d2   : > { %v669_v28 = vmax.f32 %v655_v14, 0.0 }
 0x1d3   : > { %v668_v29 = vmax.f32 %v650_v23, 0.0 }
 0x1d4   : > { %v680_v30 = vmul.f32 %v1159_v25, %v669_v28 }
 0x1d5   : > { %v679_v32 = vmul.f32 %v1159_v25, %v668_v29 }
 0x1d6   : > { %v687_v34 = vsel %vm683_vm2, %v680_v30, 0.0  ;;  %v948_v30 = vand.u32 127, %v947_v27 }
 0x1d7   : > { %v1237_v35 = vpop.f32.mrb[2].mxu1  ;;  %688 = vadd.xlane.f32.xlu1 %v687_v34  ;;  %v684_v36 = vsel %vm683_vm2, %v679_v32, 0.0 }
 0x1d8   : > { %v665_v37 = vadd.f32 %v1237_v35, %v1158_v10  ;;  %685 = vadd.xlane.f32.xlu0 %v684_v36  ;;  %v659_v38 = vpop.f32.mrb[3].mxu1  ;;  %v953_v20 = vadd.s32 4294967288, %v948_v30  ;;  %v960_v22 = vadd.s32 4294967280, %v948_v30  ;;  %v967_v35 = vadd.s32 4294967272, %v948_v30 }
 0x1d9   : > { %v660_v39 = vadd.f32 %v1158_v10, %v659_v38 }
 0x1da   : > { %v671_v40 = vmax.f32 %v665_v37, 0.0  ;;  %v956_v34 = vsub.s32 %v953_v20, %v950_v17  ;;  %v951_v37 = vsub.s32 %v948_v30, %v950_v17  ;;  %v963_v38 = vsub.s32 %v960_v22, %v950_v17 }
 0x1db   : > { %v670_v41 = vmax.f32 %v660_v39, 0.0 }
 0x1dc   : > { %v682_v42 = vmul.f32 %v1159_v25, %v671_v40 }
 0x1dd   : > { %v681_v43 = vmul.f32 %v1159_v25, %v670_v41 }
 0x1de   : > { %v693_v44 = vsel %vm683_vm2, %v682_v42, 0.0 }
 0x1df   : > { %694 = vadd.xlane.f32.xlu1 %v693_v44  ;;  %v690_v46 = vsel %vm683_vm2, %v681_v43, 0.0  ;;  %v970_v43 = vsub.s32 %v967_v35, %v950_v17 }
 0x1e0   : > { %691 = vadd.xlane.f32.xlu0 %v690_v46 }
 0x1e3   : > { %782 = vadd.xlane.f32.xlu1 %v781_v48 }
 0x1e4   : > { %779 = vadd.xlane.f32.xlu0 %v778_v50 }
 0x1e7   : > { %788 = vadd.xlane.f32.xlu1 %v787_v52 }
 0x1e8   : > { %785 = vadd.xlane.f32.xlu0 %v784_v53 }
 0x264   : > { %v689_v56 = vpop.xlane.xlu1 %688 }
 0x265   : > { %v704_v57 = vadd.f32 %v1160_v55, %v689_v56  ;;  %v686_v58 = vpop.xlane.xlu0 %685 }
 0x266   : > { %v703_v59 = vadd.f32 %v1160_v55, %v686_v58 }
 0x267   : > { %v1162_v60 = vmul.f32 -1.442695, %v704_v57 }
 0x268   : > { %v1161_v61 = vmul.f32 -1.442695, %v703_v59 }
 0x269   : > { %1365 = vpow2.f32 %v1162_v60 }
 0x26a   : > { %1367 = vpow2.f32 %v1161_v61 }
 0x26c   : > { %v695_v62 = vpop.xlane.xlu1 %694 }
 0x26d   : > { %v706_v63 = vadd.f32 %v1160_v55, %v695_v62  ;;  %v692_v0 = vpop.xlane.xlu0 %691 }
 0x26e   : > { %v705_v1 = vadd.f32 %v1160_v55, %v692_v0 }
 0x26f   : > { %v1164_v2 = vmul.f32 -1.442695, %v706_v63 }
 0x270   : > { %v1163_v3 = vmul.f32 -1.442695, %v705_v1  ;;  %v783_v25 = vpop.xlane.xlu1 %782 }
 0x271   : > { %1369 = vpow2.f32 %v1164_v2  ;;  %v780_v23 = vpop.xlane.xlu0 %779  ;;  %v822_v2 = vld [vmem:[#allocation3] sm:$0x1] }
 0x272   : > { %1371 = vpow2.f32 %v1163_v3 }
 0x273   : > { %v1366_v4 = vpop.eup %1365 }
 0x274   : > { %v1368_v5 = vpop.eup %1367  ;;  %v720_v7 = vadd.f32 1.0, %v1366_v4  ;;  %v789_v28 = vpop.xlane.xlu1 %788 }
 0x275   : > { %v719_v8 = vadd.f32 1.0, %v1368_v5  ;;  %v786_v26 = vpop.xlane.xlu0 %785 }
 0x276   : > { %1373 = vrcp.f32 %v720_v7 }
 0x277   : > { %1375 = vrcp.f32 %v719_v8  ;;  %v839_v8 = vld [vmem:[#allocation2] sm:$0xff] }
 0x27b   : > { %v1370_v9 = vpop.eup %1369 }
 0x27c   : > { %v1372_v10 = vpop.eup %1371  ;;  %v722_v12 = vadd.f32 1.0, %v1370_v9 }
 0x27d   : > { %v721_v11 = vadd.f32 1.0, %v1372_v10 }
 0x27f   : > { %1377 = vrcp.f32 %v721_v11 }
 0x280   : > { %v1374_v13 = vpop.eup %1373  ;;  %1379 = vrcp.f32 %v722_v12  ;;  %v988_v12 = vld [vmem:[%s1874_s9] sm:$0xff] }
 0x281   : > { %v1376_v14 = vpop.eup %1375  ;;  %805 = vperm.xlu1 %1356, %v1374_v13   ;;  %1381 = vrcp.f32 %v780_v23 }
 0x282   : > { %800 = vperm.xlu0 %1355, %v1376_v14   ;;  %1383 = vrcp.f32 %v783_v25 }
 0x283   : > { %1385 = vrcp.f32 %v786_v26 }
 0x284   : > { %1387 = vrcp.f32 %v789_v28 }
 0x289   : > { %v1378_v15 = vpop.eup %1377 }
 0x28a   : > { %810 = vperm.xlu1 %1356, %v1378_v15   ;;  %v1380_v18 = vpop.eup %1379 }
 0x28b   : > { %v1382_v29 = vpop.eup %1381 }
 0x28c   : > { %v794_v6 = vmul.f32 %v1382_v29, %v1745_v47  ;;  %v1384_v16 = vpop.eup %1383 }
 0x28d   : > { %v795_v24 = vmul.f32 %v1384_v16, %v1742_v45  ;;  %v1386_v33 = vpop.eup %1385 }
 0x28e   : > { %815 = vperm.xlu1 %1356, %v1380_v18   ;;  %v796_v39 = vmul.f32 %v1386_v33, %v1753_v51  ;;  %v1388_v40 = vpop.eup %1387 }
 0x28f   : > { %v797_v51 = vmul.f32 %v1388_v40, %v1749_v49 }
 0x300   : > { %v806_v21 = vpop.permute.xlu1 %805 }
 0x301   : > { %v801_v31 = vpop.permute.xlu0 %800  ;;  %v819_v36 = vmul.f32 %v806_v21, %v795_v24  ;;  %v957_v41 = vrot.slane %v806_v21, %v956_v34 }
 0x302   : > { %v818_v32 = vmul.f32 %v801_v31, %v794_v6  ;;  %v952_v45 = vrot.slane %v801_v31, %v951_v37 }
 0x303   : > { %v824_v44 = vsel %vm753_vm1, %v819_v36, 0.0 }
 0x304   : > { %840 = vxpose.xlu1.b32.start [1/4] (short) (narrow) %v818_v32, 8  ;;  %v823_v46 = vsel %vm753_vm1, %v818_v32, 0.0  ;;  %v959_v54 = vsel %vm958_vm5, %v957_v41, %v952_v45 }
 0x305   : > { %v825_v52 = vadd.f32 %v824_v44, %v823_v46 }
 0x308   : > { %841 = vxpose.xlu1.b32.cont [2/4] (short) (narrow) %v819_v36, 8 }
 0x309   : > { %v811_v42 = vpop.permute.xlu1 %810 }
 0x30a   : > { %v820_v47 = vmul.f32 %v811_v42, %v796_v39  ;;  %v964_v48 = vrot.slane %v811_v42, %v963_v38 }
 0x30c   : > { %v826_v50 = vsel %vm753_vm1, %v820_v47, 0.0  ;;  %842 = vxpose.xlu1.b32.cont [3/4] (short) (narrow) %v820_v47, 8  ;;  %v966_v58 = vsel %vm965_vm6, %v964_v48, %v959_v54 }
 0x30d   : > { %v816_v53 = vpop.permute.xlu1 %815  ;;  %v827_v57 = vadd.f32 %v826_v50, %v825_v52 }
 0x30e   : > { %v821_v55 = vmul.f32 %v816_v53, %v797_v51  ;;  %v971_v56 = vrot.slane %v816_v53, %v970_v43 }
 0x310   : > { %v828_v59 = vsel %vm753_vm1, %v821_v55, 0.0  ;;  %843 = vxpose.xlu1.b32.end [4/4] (short) (narrow) %v821_v55, 8  ;;  %v973_v60 = vsel %vm972_vm7, %v971_v56, %v966_v58 }
 0x311   : > { %v829_v61 = vadd.f32 %v828_v59, %v827_v57  ;;  %976 = vst.msk [vmem:[%s416_s16] sm:$0x1] %vm975_vm8, %v973_v60 }
 0x313   : > { %v830_v62 = vrot.slane %v829_v61, 4 }
 0x315   : > { %v831_v63 = vadd.f32 %v830_v62, %v829_v61 }
 0x317   : > { %v832_v0 = vrot.slane %v831_v63, 2 }
 0x319   : > { %v833_v49 = vadd.f32 %v832_v0, %v831_v63 }
 0x31b   : > { %v834_v1 = vrot.slane %v833_v49, 1 }
 0x31d   : > { %v835_v3 = vadd.f32 %v834_v1, %v833_v49 }
 0x31f   : > { %v836_v4 = vadd.f32 %v835_v3, %v822_v2 }
 0x321   : > { %838 = vst.msk [vmem:[#allocation3] sm:$0x1] %vm433_vm3, %v836_v4 }
 0x328   : > { %v1168_v5 = vld [vmem:[#allocation3] ss:$0 sm:$0xff] }
 0x329   : > { %986 = vbcast.lane.b32.xlu0 %v1168_v5, 256 }
 0x384   : > { %v856_v7 = vpop.trf.xlu1 }
 0x385   : > { %1247 = vmatmul.mubr.msk.f32.vlgmr.msra.gmra.mrb[8].mxu0 %vm683_vm2, %v856_v7 }
 0x39b   : > { %v987_v13 = vpop.permute.xlu0 %986 }
 0x39c   : > { %v989_v14 = vmul.f32 %v988_v12, %v987_v13 }
 0x458   : > { %v941_v9 = vpop.f32.mrb[8].mxu0 }
 0x459   : > { %v945_v10 = vadd.f32 %v941_v9, %v839_v8  ;;  %v1248_v11 = vpop.f32.mrb[9].mxu0 }
 0x45b   : > { %946 = vst.msk [vmem:[#allocation2] sm:$0xff] %vm431_vm0, %v945_v10 }
 0x462   : > { %v990_v15 = vld [vmem:[#allocation2] sm:$0xff] }
 0x463   : > { %v991_v18 = vsub.f32 %v990_v15, %v989_v14 }
 0x465   : > { %v992_v19 = vmul.f32 %v991_v18, %v991_v18 }
 0x467   : > { %v993_v23 = vsel %vm431_vm0, %v992_v19, 0.0 }
 0x468   : > { %994 = vadd.xlane.f32.xlu0 %v993_v23 }
 0x469   : > { %1406 = shalt.err (!%p1403_p5)
}
 0x46a   : > { %s1407_s16 = scalar_lea.hbm %s1791_s27, 16  ;;  %s1411_s25 = scalar_lea.hbm %s1876_s11, 32 }
 0x46b   : > { %p1408_p6 = scmp.ne.s32.totalorder %s1791_s27, %s1407_s16  ;;  %p1412_p10 = scmp.lt.u32.totalorder %s1791_s27, %s1876_s11 }
 0x46c   : > { %p1413_p11 = scmp.lt.u32.totalorder %s1411_s25, %s1407_s16  ;;  %p1415_p13 = scmp.lt.u32.totalorder %s1407_s16, %s1791_s27 }
 0x46d   : > { %p1409_p7 = pnand %p1408_p6, %p1614_p4 }
 0x46e   : > { %p1414_p12 = por %p1413_p11, %p1412_p10 }
 0x46f   : > { %p1410_p9 = pneg %p1409_p7 }
 0x470   : > { %p1416_p0 = por %p1415_p13, %p1414_p12 }
 0x472   : > { %p1417_p1 = pnand %p1416_p0, %p1410_p9 }
 0x474   : > { %1420 = shalt.err (!%p1417_p1)
}
 0x475   : > { %1292 = dma.vmem_to_hbm [thread:$0]  (%p1614_p4), %s1044_s1, 16, %s1791_s27, %s1017_s29  }
 0x476   : > { %s1150_s0 = sshll.u32 %s1774_s14, 3  ;;  %s1170_s1 = sshll.u32 %s1495_s22, 7 }
 0x477   : > { %s410_s27 = scalar_lea.vmem [#allocation5], %s1150_s0  ;;  %s1816_s6 = scalar_lea.hbm %s1875_s10, %s1170_s1 }
 0x478   : > { %s1029_s29 = sshll.u32 %s410_s27, 4  ;;  %s1012_s15 = scalar_lea.sflag [#allocation6], %s1774_s14  ;;  %s1818_s29 = int_to_ptr.vmem [resolvable:$true] %s1029_s29 }
 0x479   : > { %s1421_s25 = scalar_lea.vmem %s1818_s29, 128  ;;  %s1510_s22 = smov [#allocation5]  }
 0x47a   : > { %p1422_p2 = scmp.ne.s32.totalorder %s1818_s29, %s1421_s25  ;;  %s1425_s17 = sshll.u32 %s1510_s22, 4  ;;  %s1426_s17 = int_to_ptr.vmem [resolvable:$false] %s1425_s17 }
 0x47b   : > { %s1427_s18 = scalar_lea.vmem %s1426_s17, 256  ;;  %p1428_p6 = scmp.lt.s32.totalorder %s1818_s29, %s1426_s17 }
 0x47c   : > { %p1423_p3 = pnand %p1422_p2, %p1614_p4  ;;  %p1429_p7 = scmp.lt.s32.totalorder %s1427_s18, %s1421_s25 }
 0x47e   : > { %p1424_p5 = pneg %p1423_p3  ;;  %p1430_p9 = por %p1429_p7, %p1428_p6 }
 0x480   : > { %p1431_p10 = pnand %p1430_p9, %p1424_p5 }
 0x4f5   : > { %v995_v25 = vpop.xlane.xlu0 %994 }
 0x4f6   : > { %v996_v26 = vmax.f32 %v995_v25, 1e-24 }
 0x4f8   : > { %1389 = vrsqrt.f32 %v996_v26 }
 0x502   : > { %v1390_v27 = vpop.eup %1389 }
 0x503   : > { %v998_v28 = vmul.f32 %v1390_v27, %v1390_v27 }
 0x505   : > { %v999_v29 = vmul.f32 %v998_v28, %v995_v25 }
 0x507   : > { %v1000_v30 = vrot.slane %v999_v29, 4 }
 0x509   : > { %v1001_v6 = vadd.f32 %v1000_v30, %v999_v29 }
 0x50b   : > { %v1002_v16 = vrot.slane %v1001_v6, 2 }
 0x50d   : > { %v1003_v17 = vadd.f32 %v1002_v16, %v1001_v6 }
 0x50f   : > { %v1004_v20 = vrot.slane %v1003_v17, 1 }
 0x511   : > { %v1005_v31 = vadd.f32 %v1004_v20, %v1003_v17 }
 0x513   : > { %v1006_v32 = vmax.f32 %v1005_v31, 1e-24 }
 0x515   : > { %1391 = vrsqrt.f32 %v1006_v32 }
 0x51f   : > { %v1392_v21 = vpop.eup %1391 }
 0x520   : > { %v1008_v22 = vmul.f32 %v1392_v21, %v1390_v27 }
 0x522   : > { %v1009_v24 = vmul.f32 %v1008_v22, %v991_v18 }
 0x524   : > { %1010 = vst.msk [vmem:[%s410_s27] sm:$0xff] %vm431_vm0, %v1009_v24 }
 0x525   : > { %1434 = shalt.err (!%p1431_p10)
}
 0x526   : > { %s1435_s14 = scalar_lea.hbm %s1816_s6, 128  ;;  %s1439_s27 = scalar_lea.hbm %s1875_s10, 256 }
 0x527   : > { %p1436_p11 = scmp.ne.s32.totalorder %s1816_s6, %s1435_s14  ;;  %p1440_p0 = scmp.lt.u32.totalorder %s1816_s6, %s1875_s10 }
 0x528   : > { %p1441_p1 = scmp.lt.u32.totalorder %s1439_s27, %s1435_s14  ;;  %p1443_p3 = scmp.lt.u32.totalorder %s1435_s14, %s1816_s6 }
 0x529   : > { %p1437_p12 = pnand %p1436_p11, %p1614_p4 }
 0x52a   : > { %p1442_p2 = por %p1441_p1, %p1440_p0 }
 0x52b   : > { %p1438_p13 = pneg %p1437_p12 }
 0x52c   : > { %p1444_p5 = por %p1443_p3, %p1442_p2 }
 0x52e   : > { %p1445_p6 = pnand %p1444_p5, %p1438_p13 }
 0x530   : > { %1448 = shalt.err (!%p1445_p6)
}
 0x531   : > { %1291 = dma.vmem_to_hbm [thread:$0]  (%p1614_p4), %s1818_s29, 128, %s1816_s6, %s1012_s15  }
 0x532 PF: > { %p1302_p7 = scmp.ge.s32.totalorder %s1503_s24, 2  ;;  %s1055_s25 = sand.u32 1, %s1483_s19  }
 0x533   : > { %s1056_s22 = scalar_lea.sflag [#allocation6], %s1055_s25 }
 0x534   : > { %p1296_p9 = pnand %p1302_p7, %p1621_p8 }
 0x536   : > { %1474 = dma.done.wait (!%p1296_p9), %s1056_s22, 128  }
 0x537   : > { %1476 = vsyncadd (!%p1296_p9), %s1056_s22, 4294967168  ;;  %s1065_s17 = scalar_lea.sflag [#allocation8], %s1055_s25 }
 0x538   : > { %1478 = dma.done.wait (!%p1296_p9), %s1065_s17, 16  }
 0x539   : > { %1480 = vsyncadd (!%p1296_p9), %s1065_s17, 4294967280  ;;  %s30_s24 = sadd.s32 1, %s1503_s24   ;;  %s1883_s19 = smov %s1487_s20 }
 0x53a   : > { %p27_p10 = scmp.ge.s32.totalorder %s30_s24, 4   ;;  %s1884_s20 = smov %s1491_s21 }
 0x53b   : > { %s1885_s21 = smov %s1627_s12  ;;  %s1886_s22 = smov %s1499_s23 }
 0x53c   : > { %s1887_s23 = smov %s1889_s26  ;;  %29 = sbr.rel (!%p27_p10) target bundleno = 9 (0x9), region = 120 }
 0x543   :  { %1069 = vsyncpa [#allocation6], 1 }
 0x544   :  { %1071 = vsyncpa [#allocation6 + $0x1], 1 }
 0x545   :  { %1072 = vsyncpa [#allocation8], 1 }
 0x546   :  { %1074 = vsyncpa [#allocation8 + $0x1], 1 }

</bundles_post_ra>
